<compile_context>
chip_gen: v6e
topology: v6e:2x2x1
jax: 0.10.0
libtpu: 0.0.40
codegen_flags: <defaults>
</compile_context>

<pallas_src>
import functools

import jax
import jax.numpy as jnp
from jax.experimental import pallas as pl
from jax.experimental.pallas import tpu as pltpu


def _static_int_pow(x, gamma):
    """x ** gamma for a static gamma; integer gammas use VPU multiplies only."""
    g = float(gamma)
    if g == int(g) and 0 <= int(g) <= 16:
        gi = int(g)
        result = None
        base = x
        while gi:
            if gi & 1:
                result = base if result is None else result * base
            gi >>= 1
            if gi:
                base = base * base
        return jnp.ones_like(x) if result is None else result
    # Non-integer gamma falls back to pow (EUP); q is clamped >= 0 by caller.
    return x ** g


def _focal_loss_kernel(logits_ref, targets_ref, out_ref, *,
                       alpha, gamma, total_n, block_rows, has_padding):
    i = pl.program_id(0)

    x = logits_ref[...].astype(jnp.float32)            # (TM, C)
    t = targets_ref[...]                               # (TM, 1) int32

    # Per-row max for a numerically-stable logsumexp along the class (lane)
    # axis.
    m = jnp.max(x, axis=-1, keepdims=True)             # (TM, 1)

    # Gather the target class' RAW logit with a one-hot select (lane iota);
    # `x - m` then has a single consumer (the exp pass) and need not be
    # materialized as a full (TM, C) f32 intermediate.
    col = jax.lax.broadcasted_iota(jnp.int32, x.shape, 1)
    picked_x = jnp.sum(jnp.where(col == t, x, 0.0), axis=-1, keepdims=True)

    lse = jnp.log(jnp.sum(jnp.exp(x - m), axis=-1, keepdims=True))  # (TM, 1)

    logp_t = picked_x - m - lse                         # (TM, 1)
    p_t = jnp.exp(logp_t)
    q = jnp.maximum(1.0 - p_t, 0.0)                     # clamp: p_t may round >1
    focal = (-alpha) * _static_int_pow(q, gamma) * logp_t   # (TM, 1)

    # Per-block partial sum written to this block's own output tile; the
    # cross-block sum happens in the wrapper, so the grid axis is parallel.
    if has_padding:
        last = pl.num_programs(0) - 1

        @pl.when(i == last)
        def _masked():
            row = i * block_rows + jax.lax.broadcasted_iota(
                jnp.int32, focal.shape, 0)
            partial = jnp.sum(jnp.where(row < total_n, focal, 0.0))
            out_ref[...] = jnp.broadcast_to(partial, out_ref.shape)

        @pl.when(i != last)
        def _full():
            out_ref[...] = jnp.broadcast_to(jnp.sum(focal), out_ref.shape)
    else:
        out_ref[...] = jnp.broadcast_to(jnp.sum(focal), out_ref.shape)


def _round_up(x, m):
    return ((x + m - 1) // m) * m


def focal_loss(logits, targets, *, alpha=1.0, gamma=2.0, reduction="mean",
               block_rows=None):
    """Focal loss over the last (class) axis.  logits: (N, C), targets: (N,)."""
    if reduction not in ("mean", "sum"):
        # TODO(synk): reduction='none' (per-row loss output) not implemented.
        raise NotImplementedError("reduction must be 'mean' or 'sum'")

    N, C = logits.shape
    itemsize = jnp.dtype(logits.dtype).itemsize
    sublane_align = 8 * (4 // itemsize)   # 8 for f32, 16 for bf16, 32 for int8

    if block_rows is None:
        # Size the tile from the f32 working set, not just the raw input:
        #   2 x double-buffered logits tile (input dtype)
        # + ~3 f32 tile-sized intermediates (upcast copy, exp pass, one-hot
        #   select) that Mosaic may materialize
        # + double-buffered targets column.
        # ~32 MiB working set keeps us under the 48 MiB limit everywhere,
        # including v7x (64 MiB physical VMEM).
        per_row_bytes = C * (2 * itemsize + 3 * 4) + 2 * 4
        budget_bytes = 32 * 1024 * 1024
        block_rows = budget_bytes // max(1, per_row_bytes)
        block_rows = min(block_rows, 32768)   # generous sanity cap only
    block_rows = max(sublane_align,
                     (block_rows // sublane_align) * sublane_align)
    block_rows = min(block_rows, _round_up(N, sublane_align))

    num_blocks = pl.cdiv(N, block_rows)
    has_padding = (N % block_rows) != 0
    targets2d = targets.astype(jnp.int32).reshape(N, 1)

    kernel = functools.partial(
        _focal_loss_kernel, alpha=float(alpha), gamma=float(gamma),
        total_n=N, block_rows=block_rows, has_padding=has_padding)

    # One (8, 128) f32 tile per block: keeps the out BlockSpec on full native
    # tiles (no sub-(8,128) blocks) and gives every parallel grid step its
    # own HBM tile to write.  Wrapper reads partials from [:, 0, 0].
    partials = pl.pallas_call(
        kernel,
        out_shape=jax.ShapeDtypeStruct((num_blocks, 8, 128), jnp.float32),
        grid=(num_blocks,),
        in_specs=[
            pl.BlockSpec((block_rows, C), lambda i: (i, 0)),
            pl.BlockSpec((block_rows, 1), lambda i: (i, 0)),
        ],
        out_specs=pl.BlockSpec((1, 8, 128), lambda i: (i, 0, 0)),
        compiler_params=pltpu.CompilerParams(
            # Fully independent blocks -> safe to shard across TensorCores
            # on v7x; neutral on v5e/v6e (single TC).
            dimension_semantics=("parallel",),
            vmem_limit_bytes=48 * 1024 * 1024,
        ),
    )(logits, targets2d)

    total = jnp.sum(partials[:, 0, 0])
    if reduction == "mean":
        total = total * jnp.float32(1.0 / N)
    return total


def _focal_loss_ref(logits, targets, alpha=1.0, gamma=2.0, reduction="mean"):
    log_prob = jax.nn.log_softmax(logits.astype(jnp.float32), axis=-1)
    logp_t = jnp.take_along_axis(log_prob, targets[:, None], axis=-1)[:, 0]
    p_t = jnp.exp(logp_t)
    loss = -alpha * (1.0 - p_t) ** gamma * logp_t
    return jnp.mean(loss) if reduction == "mean" else jnp.sum(loss)


if __name__ == "__main__":
    key = jax.random.PRNGKey(0)
    k1, k2 = jax.random.split(key)
    # Small synthetic shapes; N=72 with block_rows=16 gives a 5-step grid
    # whose last block is partial, exercising the masked-last-block path and
    # the per-block partial-sum reduction.
    N, C = 72, 32
    logits = jax.random.normal(k1, (N, C), dtype=jnp.float32)
    targets = jax.random.randint(k2, (N,), 0, C, dtype=jnp.int32)

    # Forced small tile: multi-block parallel grid with a partial last block.
    loss_small = focal_loss(logits, targets, alpha=1.0, gamma=2.0,
                            block_rows=16)
    # Auto-sized tile: single block, no masking path.
    loss_auto = focal_loss(logits, targets, alpha=1.0, gamma=2.0)
    # 'sum' reduction and a different alpha.
    loss_sum = focal_loss(logits, targets, alpha=0.5, gamma=2.0,
                          reduction="sum", block_rows=16)
    jax.block_until_ready((loss_small, loss_auto, loss_sum))

    ref_mean = _focal_loss_ref(logits, targets, 1.0, 2.0, "mean")
    ref_sum = _focal_loss_ref(logits, targets, 0.5, 2.0, "sum")
    assert jnp.allclose(loss_small, ref_mean, atol=1e-5, rtol=1e-5), (
        loss_small, ref_mean)
    assert jnp.allclose(loss_auto, ref_mean, atol=1e-5, rtol=1e-5), (
        loss_auto, ref_mean)
    assert jnp.allclose(loss_sum, ref_sum, atol=1e-4, rtol=1e-5), (
        loss_sum, ref_sum)
    print("KERNEL_OK")
</pallas_src>

<mosaic_0001>
module attributes {stable_mosaic.version = 11 : i64} {
  func.func @_focal_loss_kernel(%arg0: i32, %arg1: memref<16x32xf32, #tpu.memory_space<vmem>>, %arg2: memref<16x1xi32, #tpu.memory_space<vmem>>, %arg3: memref<1x8x128xf32, #tpu.memory_space<vmem>>) attributes {dimension_semantics = [#tpu.dimension_semantics<parallel>], iteration_bounds = array<i64: 5>, scalar_prefetch = 0 : i64, scratch_operands = 0 : i64, tpu.core_type = #tpu.core_type<tc>, window_params = [{transform_indices = @transform_0, window_bounds = array<i64: 16, 32>}, {transform_indices = @transform_1, window_bounds = array<i64: 16, 1>}, {transform_indices = @transform_2, window_bounds = array<i64: 1, 8, 128>}]} {
    %c0 = arith.constant 0 : index
    %c0_0 = arith.constant 0 : index
    %0 = vector.load %arg1[%c0, %c0_0] : memref<16x32xf32, #tpu.memory_space<vmem>>, vector<16x32xf32>
    %c0_1 = arith.constant 0 : index
    %c0_2 = arith.constant 0 : index
    %1 = vector.load %arg2[%c0_1, %c0_2] : memref<16x1xi32, #tpu.memory_space<vmem>>, vector<16x1xi32>
    %cst = arith.constant dense<0xFF800000> : vector<16xf32>
    %2 = vector.multi_reduction <maximumf>, %0, %cst [1] : vector<16x32xf32> to vector<16xf32>
    %3 = vector.shape_cast %2 : vector<16xf32> to vector<16x1xf32>
    %4 = tpu.iota {dimensions = array<i32: 1>} : vector<16x32xi32>
    %5 = vector.broadcast %1 : vector<16x1xi32> to vector<16x32xi32>
    %6 = arith.cmpi eq, %4, %5 : vector<16x32xi32>
    %cst_3 = arith.constant 0.000000e+00 : f32
    %7 = vector.broadcast %cst_3 : f32 to vector<16x32xf32>
    %8 = arith.select %6, %0, %7 : vector<16x32xi1>, vector<16x32xf32>
    %cst_4 = arith.constant dense<0.000000e+00> : vector<16xf32>
    %9 = vector.multi_reduction <add>, %8, %cst_4 [1] : vector<16x32xf32> to vector<16xf32>
    %10 = vector.shape_cast %9 : vector<16xf32> to vector<16x1xf32>
    %11 = vector.broadcast %3 : vector<16x1xf32> to vector<16x32xf32>
    %12 = arith.subf %0, %11 : vector<16x32xf32>
    %13 = math.exp %12 : vector<16x32xf32>
    %cst_5 = arith.constant dense<0.000000e+00> : vector<16xf32>
    %14 = vector.multi_reduction <add>, %13, %cst_5 [1] : vector<16x32xf32> to vector<16xf32>
    %15 = vector.shape_cast %14 : vector<16xf32> to vector<16x1xf32>
    %16 = math.log %15 : vector<16x1xf32>
    %17 = arith.subf %10, %3 : vector<16x1xf32>
    %18 = arith.subf %17, %16 : vector<16x1xf32>
    %19 = math.exp %18 : vector<16x1xf32>
    %cst_6 = arith.constant 1.000000e+00 : f32
    %20 = vector.broadcast %cst_6 : f32 to vector<16x1xf32>
    %21 = arith.subf %20, %19 : vector<16x1xf32>
    %cst_7 = arith.constant 0.000000e+00 : f32
    %22 = vector.broadcast %cst_7 : f32 to vector<16x1xf32>
    %23 = arith.maximumf %21, %22 : vector<16x1xf32>
    %24 = arith.mulf %23, %23 : vector<16x1xf32>
    %cst_8 = arith.constant -1.000000e+00 : f32
    %25 = vector.broadcast %cst_8 : f32 to vector<16x1xf32>
    %26 = arith.mulf %25, %24 : vector<16x1xf32>
    %27 = arith.mulf %26, %18 : vector<16x1xf32>
    %c4_i32 = arith.constant 4 : i32
    %28 = arith.cmpi eq, %arg0, %c4_i32 : i32
    %29 = arith.extui %28 : i1 to i32
    %c0_i32 = arith.constant 0 : i32
    %30 = arith.cmpi ne, %29, %c0_i32 : i32
    scf.if %30 {
      %c16_i32 = arith.constant 16 : i32
      %34 = arith.muli %arg0, %c16_i32 : i32
      %35 = tpu.iota {dimensions = array<i32: 0>} : vector<16x1xi32>
      %36 = vector.broadcast %34 : i32 to vector<16x1xi32>
      %37 = arith.addi %36, %35 : vector<16x1xi32>
      %c72_i32 = arith.constant 72 : i32
      %38 = vector.broadcast %c72_i32 : i32 to vector<16x1xi32>
      %39 = arith.cmpi slt, %37, %38 : vector<16x1xi32>
      %cst_11 = arith.constant 0.000000e+00 : f32
      %40 = vector.broadcast %cst_11 : f32 to vector<16x1xf32>
      %41 = arith.select %39, %27, %40 : vector<16x1xi1>, vector<16x1xf32>
      %42 = vector.shape_cast %41 : vector<16x1xf32> to vector<1x16x1xf32>
      %cst_12 = arith.constant dense<0.000000e+00> : vector<1xf32>
      %43 = vector.multi_reduction <add>, %42, %cst_12 [1, 2] : vector<1x16x1xf32> to vector<1xf32>
      %44 = vector.shape_cast %43 : vector<1xf32> to vector<1x1x1xf32>
      %45 = vector.extract %44[0, 0, 0] : f32 from vector<1x1x1xf32>
      %46 = vector.broadcast %45 : f32 to vector<1x8x128xf32>
      %c0_13 = arith.constant 0 : index
      %c0_14 = arith.constant 0 : index
      %c0_15 = arith.constant 0 : index
      %47 = vector.load %arg3[%c0_13, %c0_14, %c0_15] : memref<1x8x128xf32, #tpu.memory_space<vmem>>, vector<1x8x128xf32>
      tpu.vector_store %arg3[%c0_13, %c0_14, %c0_15], %46 {strides = array<i32>} : memref<1x8x128xf32, #tpu.memory_space<vmem>>, vector<1x8x128xf32>,
    } else {
    }
    %c4_i32_9 = arith.constant 4 : i32
    %31 = arith.cmpi ne, %arg0, %c4_i32_9 : i32
    %32 = arith.extui %31 : i1 to i32
    %c0_i32_10 = arith.constant 0 : i32
    %33 = arith.cmpi ne, %32, %c0_i32_10 : i32
    scf.if %33 {
      %34 = vector.shape_cast %27 : vector<16x1xf32> to vector<1x16x1xf32>
      %cst_11 = arith.constant dense<0.000000e+00> : vector<1xf32>
      %35 = vector.multi_reduction <add>, %34, %cst_11 [1, 2] : vector<1x16x1xf32> to vector<1xf32>
      %36 = vector.shape_cast %35 : vector<1xf32> to vector<1x1x1xf32>
      %37 = vector.extract %36[0, 0, 0] : f32 from vector<1x1x1xf32>
      %38 = vector.broadcast %37 : f32 to vector<1x8x128xf32>
      %c0_12 = arith.constant 0 : index
      %c0_13 = arith.constant 0 : index
      %c0_14 = arith.constant 0 : index
      %39 = vector.load %arg3[%c0_12, %c0_13, %c0_14] : memref<1x8x128xf32, #tpu.memory_space<vmem>>, vector<1x8x128xf32>
      tpu.vector_store %arg3[%c0_12, %c0_13, %c0_14], %38 {strides = array<i32>} : memref<1x8x128xf32, #tpu.memory_space<vmem>>, vector<1x8x128xf32>,
    } else {
    }
    return
  }
  func.func @transform_0(%arg0: i32) -> (i32, i32) {
    %c0_i32 = arith.constant 0 : i32
    %c0_i32_0 = arith.constant 0 : i32
    return %arg0, %c0_i32 : i32, i32
  }
  func.func @transform_1(%arg0: i32) -> (i32, i32) {
    %c0_i32 = arith.constant 0 : i32
    %c0_i32_0 = arith.constant 0 : i32
    return %arg0, %c0_i32 : i32, i32
  }
  func.func @transform_2(%arg0: i32) -> (i32, i32, i32) {
    %c0_i32 = arith.constant 0 : i32
    %c0_i32_0 = arith.constant 0 : i32
    %c0_i32_1 = arith.constant 0 : i32
    return %arg0, %c0_i32, %c0_i32_0 : i32, i32, i32
  }
}

</mosaic_0001>

<bundles_post_ra>
// kernel: tpu_custom_call.1
= control target key start
LH: loop header
LB: loop body
LE: loop exit
PB: predicated region body
PF: predicated region fallthrough
CT: control target
= control target key end

     0   :  { %7 = vsyncpa [#allocation3], 0  ;;  %s669_s0 = inlined_call_operand.vmem [shape: f32[72,32], index: 0, kind: input, shape index: {}]   ;;  %s670_s1 = inlined_call_operand.vmem [shape: s32[72,1], index: 1, kind: input, shape index: {}]   ;;  %s671_s2 = inlined_call_operand.hbm [shape: f32[5,8,128], index: 2, kind: output, shape index: {}]  }
   0x1   :  { %9 = vsyncpa [#allocation3 + $0x1], 0  ;;  %s556_s9 = smov 0   ;;  %s558_s10 = smov 0  }
   0x2   :  { %s560_s11 = smov 0   ;;  %s562_s12 = smov 0  }
   0x3 LB: > { %s577_s13 = sadd.s32 4294967295, %s537_s12   ;;  %s403_s14 = sadd.s32 4294967294, %s537_s12   ;;  %s537_s12 = sphi %s562_s12, %s677_s12   ;;  %s533_s11 = sphi %s560_s11, %s676_s11   ;;  %s529_s10 = sphi %s558_s10, %s675_s10   ;;  %s525_s9 = sphi %s556_s9, %s674_s9  }
   0x4   : > { %s581_s15 = sadd.s32 1, %s537_s12   ;;  %s74_s16 = sadd.s32 1, %s533_s11 }
   0x5   : > { %s71_s17 = ssub.s32 %s537_s12, %s581_s15  ;;  %p84_p0 = scmp.ne.s32.totalorder %s533_s11, %s529_s10 }
   0x6   : > { %p72_p1 = scmp.eq.s32.totalorder %s71_s17, 0  ;;  %p85_p2 = scmp.eq.s32.totalorder %s577_s13, 4 }
   0x7   : > { %p90_p3 = scmp.ne.s32.totalorder %s529_s10, %s525_s9  ;;  %p91_p4 = scmp.eq.s32.totalorder %s403_s14, 4 }
   0x8   : > { %s592_s18 = scalar_select %p72_p1, %s533_s11, %s74_s16  }
   0x9   : > { %p596_p5 = por %p85_p2, %p84_p0  ;;  %p600_p6 = por %p91_p4, %p90_p3 }
   0xa   : > { %p406_p7 = scmp.ge.s32.totalorder %s537_s12, 1  ;;  %p143_p8 = scmp.lt.s32.totalorder %s537_s12, 6 }
   0xc   : > { %p144_p9 = pnand %p406_p7, %p143_p8 }
   0xd   : > { %s408_s21 = sshll.u32 (!%p144_p9), %s577_s13, 1  ;;  %s175_s29 = sand.u32 (!%p144_p9), 1, %s529_s10  }
   0xe   : > { %147 = sbr.rel (%p144_p9) target bundleno = 813 (0x32d), region = 28  ;;  %p183_p10 = scmp.lt.s32.totalorder (!%p144_p9), %s408_s21, 8 }
   0xf   : > { %s622_s30 = sshll.u32 (!%p144_p9), %s175_s29, 3  ;;  %p412_p11 = scmp.ne.s32.totalorder (!%p144_p9), %s577_s13, 4 }
  0x10   : > { %s625_s3 = scalar_lea.vmem (!%p144_p9), [#allocation2], %s622_s30 }
  0x13   : > { %v539_v0 = vmov 0   ;;  %s679_s21 = smov (!%p183_p10, %s408_s21), 8  ;;  %vm210_vm0 = vcmask 261120   ;;  %v217_v13 = vlaneseq  ;;  %s413_s4 = sshll.u32 (!%p412_p11), %s577_s13, 4 }
  0x14   : > { %463 = vset.pattern.permute.xlu1 %v539_v0  ;;  %464 = vset.pattern.permute.xlu0 %v539_v0  ;;  %s409_s22 = sshll.u32 %s679_s21, 3 }
  0x15   : > { %s186_s25 = scalar_lea.vmem %s669_s0, %s409_s22  ;;  %s200_s28 = scalar_lea.vmem %s670_s1, %s409_s22  ;;  %v218_v15 = vand.u32 127, %v217_v13 }
  0x16   : > { %v206_v1 = vld [vmem:[%s186_s25] sm:$0xff]  ;;  %v207_v2 = vld [vmem:[%s186_s25 + $0x8] sm:$0xff] }
  0x17   : > { %v208_v3 = vld [vmem:[%s200_s28] sm:$0xff]  ;;  %v211_v4 = vsel %vm210_vm0, %v206_v1, -inf  ;;  %v209_v5 = vld [vmem:[%s200_s28 + $0x8] sm:$0xff]  ;;  %v214_v6 = vsel %vm210_vm0, %v207_v2, -inf }
  0x18   : > { %220 = vperm.xlu1 %463, %v208_v3   ;;  %212 = vmax.xlane.f32.xlu0 %v211_v4 }
  0x1c   : > { %223 = vperm.xlu1 %463, %v209_v5   ;;  %215 = vmax.xlane.f32.xlu0 %v214_v6 }
  0x93   : > { %v221_v14 = vpop.permute.xlu1 %220 }
  0x94   : > { %vm225_vm1 = vcmp.eq.s32.totalorder %v218_v15, %v221_v14 }
  0x95   : > { %v227_v18 = vsel %vm225_vm1, %v206_v1, 0.0 }
  0x96   : > { %v229_v20 = vsel %vm210_vm0, %v227_v18, 0.0 }
  0x97   : > { %v224_v16 = vpop.permute.xlu1 %223 }
  0x98   : > { %vm226_vm2 = vcmp.eq.s32.totalorder %v218_v15, %v224_v16 }
  0x99   : > { %v228_v22 = vsel %vm226_vm2, %v207_v2, 0.0 }
  0x9a   : > { %v232_v24 = vsel %vm210_vm0, %v228_v22, 0.0 }
  0xa1   : > { %v213_v7 = vpop.xlane.xlu0 %212 }
  0xa2   : > { %v235_v8 = vsub.f32 %v206_v1, %v213_v7 }
  0xa4   : > { %v237_v9 = vmul.f32 1.442695, %v235_v8 }
  0xa5   : > { %v216_v10 = vpop.xlane.xlu0 %215 }
  0xa6   : > { %465 = vpow2.f32 %v237_v9  ;;  %v236_v11 = vsub.f32 %v207_v2, %v216_v10 }
  0xa8   : > { %v239_v12 = vmul.f32 1.442695, %v236_v11 }
  0xaa   : > { %467 = vpow2.f32 %v239_v12 }
  0xb3   : > { %v466_v17 = vpop.eup %465 }
  0xb4   : > { %v241_v19 = vsel %vm210_vm0, %v466_v17, 0.0 }
  0xb5   : > { %242 = vadd.xlane.f32.xlu0 %v241_v19 }
  0xb7   : > { %v468_v21 = vpop.eup %467 }
  0xb8   : > { %v244_v23 = vsel %vm210_vm0, %v468_v21, 0.0 }
  0xb9   : > { %230 = vadd.xlane.f32.xlu0 %v229_v20  ;;  %245 = vadd.xlane.f32.xlu1 %v244_v23 }
  0xbd   : > { %233 = vadd.xlane.f32.xlu0 %v232_v24 }
 0x13e   : > { %v243_v25 = vpop.xlane.xlu0 %242 }
 0x13f   : > { %469 = vlog2.f32 %v243_v25 }
 0x142   : > { %v246_v26 = vpop.xlane.xlu1 %245  ;;  %v231_v27 = vpop.xlane.xlu0 %230 }
 0x143   : > { %471 = vlog2.f32 %v246_v26  ;;  %v251_v30 = vsub.f32 %v231_v27, %v213_v7 }
 0x146   : > { %v234_v31 = vpop.xlane.xlu0 %233 }
 0x147   : > { %v252_v36 = vsub.f32 %v234_v31, %v216_v10 }
 0x14c   : > { %v470_v28 = vpop.eup %469 }
 0x14d   : > { %v248_v29 = vmul.f32 0.6931472, %v470_v28 }
 0x14f   : > { %v253_v32 = vsub.f32 %v251_v30, %v248_v29 }
 0x150   : > { %v472_v33 = vpop.eup %471 }
 0x151   : > { %v250_v34 = vmul.f32 0.6931472, %v472_v33  ;;  %v255_v35 = vmul.f32 1.442695, %v253_v32 }
 0x153   : > { %473 = vpow2.f32 %v255_v35  ;;  %v254_v37 = vsub.f32 %v252_v36, %v250_v34 }
 0x155   : > { %v257_v38 = vmul.f32 1.442695, %v254_v37 }
 0x157   : > { %475 = vpow2.f32 %v257_v38 }
 0x160   : > { %v474_v39 = vpop.eup %473 }
 0x161   : > { %v259_v40 = vsub.f32 1.0, %v474_v39 }
 0x163   : > { %v261_v41 = vmax.f32 %v259_v40, 0.0 }
 0x164   : > { %v476_v42 = vpop.eup %475 }
 0x165   : > { %v263_v43 = vmul.f32 %v261_v41, %v261_v41  ;;  %v260_v44 = vsub.f32 1.0, %v476_v42 }
 0x167   : > { %v265_v45 = vmul.f32 -1.0, %v263_v43  ;;  %v262_v46 = vmax.f32 %v260_v44, 0.0 }
 0x169   : > { %v267_v47 = vmul.f32 %v265_v45, %v253_v32  ;;  %v264_v48 = vmul.f32 %v262_v46, %v262_v46  ;;  %272 = sbr.rel (%p412_p11) target bundleno = 579 (0x243), region = 32 }
 0x16b   : > { %v266_v49 = vmul.f32 -1.0, %v264_v48 }
 0x16d   : > { %v268_v50 = vmul.f32 %v266_v49, %v254_v37 }
 0x16e   : > { %v275_v51 = vshrl.u32 %v217_v13, 7  ;;  %v277_v52 = vstv %s413_s4  ;;  %vm284_vm3 = vcmask 7168  }
 0x170   : > { %v276_v53 = vadd.s32 8, %v275_v51  ;;  %v278_v54 = vadd.s32 %v277_v52, %v275_v51 }
 0x172   : > { %v279_v55 = vadd.s32 %v277_v52, %v276_v53  ;;  %vm280_vm4 = vcmp.lt.s32.totalorder %v278_v54, 72 }
 0x173   : > { %v282_v56 = vsel %vm280_vm4, %v267_v47, 0.0 }
 0x174   : > { %vm281_vm5 = vcmp.lt.s32.totalorder %v279_v55, 72  ;;  %v285_v57 = vsel %vm284_vm3, %v282_v56, 0.0 }
 0x175   : > { %v283_v58 = vsel %vm281_vm5, %v268_v50, 0.0 }
 0x176   : > { %v286_v59 = vsel %vm284_vm3, %v283_v58, 0.0 }
 0x177   : > { %v287_v60 = vadd.f32 %v286_v59, %v285_v57 }
 0x179   : > { %288 = vadd.xlane.f32.xlu0 %v287_v60 }
 0x202   : > { %v289_v61 = vpop.xlane.xlu0 %288 }
 0x203   : > { %v290_v62 = vrot.slane %v289_v61, 4 }
 0x205   : > { %v291_v63 = vadd.f32 %v290_v62, %v289_v61 }
 0x207   : > { %v292_v0 = vrot.slane %v291_v63, 2 }
 0x209   : > { %v293_v1 = vadd.f32 %v292_v0, %v291_v63 }
 0x20b   : > { %v294_v2 = vrot.slane %v293_v1, 1 }
 0x20d   : > { %v295_v3 = vadd.f32 %v294_v2, %v293_v1 }
 0x20f   : > { %419 = vpush %v295_v3 }
 0x240   : > { %s420_s5 = spop %419 }
 0x241   : > { %v297_v4 = vstv %s420_s5 }
 0x242   : > { %298 = vst [vmem:[%s625_s3] sm:$0xff] %v297_v4 }
 0x243 PF: > { %302 = sbr.rel (%p85_p2) target bundleno = 790 (0x316), region = 36 }
 0x248   : > { %vm303_vm6 = vcmask 7168  }
 0x249   : > { %v304_v5 = vsel %vm303_vm6, %v267_v47, 0.0  ;;  %v305_v6 = vsel %vm303_vm6, %v268_v50, 0.0 }
 0x24a   : > { %v306_v7 = vadd.f32 %v305_v6, %v304_v5 }
 0x24c   : > { %307 = vadd.xlane.f32.xlu0 %v306_v7 }
 0x2d5   : > { %v308_v8 = vpop.xlane.xlu0 %307 }
 0x2d6   : > { %v309_v9 = vrot.slane %v308_v8, 4 }
 0x2d8   : > { %v310_v10 = vadd.f32 %v309_v9, %v308_v8 }
 0x2da   : > { %v311_v11 = vrot.slane %v310_v10, 2 }
 0x2dc   : > { %v312_v12 = vadd.f32 %v311_v11, %v310_v10 }
 0x2de   : > { %v313_v13 = vrot.slane %v312_v12, 1 }
 0x2e0   : > { %v314_v14 = vadd.f32 %v313_v13, %v312_v12 }
 0x2e2   : > { %421 = vpush %v314_v14 }
 0x313   : > { %s422_s6 = spop %421 }
 0x314   : > { %v316_v15 = vstv %s422_s6 }
 0x315   : > { %317 = vst [vmem:[%s625_s3] sm:$0xff] %v316_v15 }
 0x316 PF: > { %s416_s7 = sshll.u32 %s577_s13, 7  ;;  %s332_s17 = sshll.u32 %s625_s3, 4  ;;  %s333_s17 = int_to_ptr.vmem [resolvable:$true] %s332_s17 }
 0x317   : > { %s330_s16 = scalar_lea.hbm %s671_s2, %s416_s7  ;;  %s319_s21 = scalar_lea.sflag [#allocation3], %s175_s29 }
 0x318   : > { %s477_s22 = scalar_lea.vmem %s333_s17, 128  ;;  %s540_s23 = smov [#allocation2]  }
 0x319   : > { %p478_p12 = scmp.ne.s32.totalorder %s333_s17, %s477_s22  ;;  %s481_s24 = sshll.u32 %s540_s23, 4  ;;  %s482_s24 = int_to_ptr.vmem [resolvable:$false] %s481_s24 }
 0x31a   : > { %s483_s25 = scalar_lea.vmem %s482_s24, 256  ;;  %p484_p1 = scmp.lt.s32.totalorder %s333_s17, %s482_s24 }
 0x31b   : > { %p479_p13 = pnand %p478_p12, %p596_p5  ;;  %p485_p2 = scmp.lt.s32.totalorder %s483_s25, %s477_s22 }
 0x31d   : > { %p480_p0 = pneg %p479_p13  ;;  %p486_p3 = por %p485_p2, %p484_p1 }
 0x31f   : > { %p487_p4 = pnand %p486_p3, %p480_p0 }
 0x321   : > { %490 = shalt.err (!%p487_p4)
}
 0x322   : > { %s491_s13 = scalar_lea.hbm %s330_s16, 128  ;;  %s495_s28 = scalar_lea.hbm %s671_s2, 640 }
 0x323   : > { %p492_p7 = scmp.ne.s32.totalorder %s330_s16, %s491_s13  ;;  %p496_p10 = scmp.lt.s32.totalorder %s330_s16, %s671_s2 }
 0x324   : > { %p497_p11 = scmp.lt.s32.totalorder %s495_s28, %s491_s13 }
 0x325   : > { %p493_p8 = pnand %p492_p7, %p596_p5 }
 0x326   : > { %p498_p12 = por %p497_p11, %p496_p10 }
 0x327   : > { %p494_p9 = pneg %p493_p8 }
 0x329   : > { %p499_p13 = pnand %p498_p12, %p494_p9 }
 0x32b   : > { %502 = shalt.err (!%p499_p13)
}
 0x32c   : > { %423 = dma.vmem_to_hbm [thread:$0]  (%p596_p5), %s333_s17, 128, %s330_s16, %s319_s21  }
 0x32d PF: > { %p429_p0 = scmp.ge.s32.totalorder %s537_s12, 2  ;;  %s344_s3 = sand.u32 1, %s525_s9  }
 0x32e   : > { %s345_s4 = scalar_lea.sflag [#allocation3], %s344_s3 }
 0x32f   : > { %p426_p1 = pnand %p429_p0, %p600_p6 }
 0x331   : > { %p427_p2 = pneg %p426_p1 }
 0x333   : > { %520 = dma.done.wait (%p427_p2), %s345_s4, 128  }
 0x334   : > { %522 = vsyncadd (%p427_p2), %s345_s4, 4294967168  ;;  %p12_p3 = scmp.ge.s32.totalorder %s581_s15, 7   ;;  %s674_s9 = smov %s529_s10 }
 0x335   : > { %s675_s10 = smov %s533_s11  ;;  %s676_s11 = smov %s592_s18 }
 0x336   : > { %s677_s12 = smov %s581_s15  ;;  %14 = sbr.rel (!%p12_p3) target bundleno = 3 (0x3), region = 74 }
 0x33b   :  { %350 = vsyncpa [#allocation3], 1 }
 0x33c   :  { %352 = vsyncpa [#allocation3 + $0x1], 1 }

</bundles_post_ra>
